<compile_context>
chip_gen: v5e
topology: v5e:2x2
jax: 0.10.0
libtpu: 0.0.40
codegen_flags: <defaults>
</compile_context>

<pallas_src>
import jax
import jax.numpy as jnp
from jax.experimental import pallas as pl
from jax.experimental.pallas import tpu as pltpu


# ----------------------------- fused Pallas kernel ---------------------------


def _attention_kernel(x_ref, at_ref, b_ref, o_ref):
    """Pool -> folded channel matvec -> ReLU -> rescale, for one batch group.

    x_ref : (R, HW)  R = NB*C rows (NB samples stacked on sublanes), HW on lanes
    at_ref: (R, R)   block-diagonal A^T (Linear∘conv∘BN fold, 1/HW folded in)
    b_ref : (R, 1)   folded bias column, tiled per sample
    o_ref : (R, HW)  output = x * att  (lane-dense, unmasked stores)
    """
    x = x_ref[...]                                   # (R, HW)

    # Global average pool: plain lane-reduce sum (1/HW is folded into at_ref).
    pooled = jnp.sum(x, axis=-1, keepdims=True)      # (R, 1)

    at = at_ref[...]                                 # (R, R) -- one vreg
    att = b_ref[...]                                 # (R, 1)
    # Tiny per-sample (C x C) matvec on the VPU: unrolled FMAs over the R
    # contraction rows; block-diagonal weights zero out cross-sample terms.
    # Deliberately kept off the MXU (K = C = 4 would leave it >95% idle).
    for r_in in range(x.shape[0]):
        att = att + pooled[r_in:r_in + 1, :] * at[:, r_in:r_in + 1]
    att = jnp.maximum(att, 0.0)                      # ReLU

    # Channel-wise rescale of the input (broadcast over the HW lanes).
    o_ref[...] = x * att


# ------------------------------ Python wrapper --------------------------------


def attention_forward(x_nchw, params, eps=1e-5):
    """x_nchw: (N, C, H, W) float32 -> (N, C, H, W) float32."""
    N, C, H, W = x_nchw.shape
    HW = H * W

    # ---- parameter folds (plain JAX, outside the kernel) ----
    # 1) Fold inference-mode BatchNorm into the bias-free 1x1 conv (exact).
    s = params["bn_g"] / jnp.sqrt(params["bn_v"] + eps)          # (C,)
    t = params["bn_b"] - s * params["bn_m"]                      # (C,)
    wc_folded = params["wc"] * s[:, None]                        # (C, F)
    # 2) Fold Linear(C->F) with the folded conv (F->C): no nonlinearity in
    #    between, so a single (C,C) matrix + (C,) bias is exact. Fold 1/HW so
    #    the in-kernel pool is a plain sum.
    a_fold = (params["wfc"] @ wc_folded.T) / HW                  # (C, C)
    b_fold = params["bfc"][0] @ wc_folded.T + t                  # (C,)

    # ---- batch-group layout: fill the 8 sublanes per vreg ----
    NB = max(1, 8 // C)                                          # samples per grid step
    n_pad = (-N) % NB
    if n_pad:
        x_nchw = jnp.concatenate(
            [x_nchw, jnp.zeros((n_pad, C, H, W), x_nchw.dtype)], axis=0)
    NP = N + n_pad
    R = NB * C
    G = NP // NB

    # Lane-dense activation layout: rows = (sample, channel), lanes = H*W.
    xf = x_nchw.reshape(NP * C, HW)

    # Block-diagonal A^T over the NB samples of a group, plus tiled bias column.
    at_big = jnp.einsum(
        "bd,ij->bidj", jnp.eye(NB, dtype=jnp.float32), a_fold.T
    ).reshape(R, R)
    b_big = jnp.tile(b_fold, NB)[:, None]                        # (R, 1)

    out = pl.pallas_call(
        _attention_kernel,
        out_shape=jax.ShapeDtypeStruct((NP * C, HW), jnp.float32),
        grid=(G,),
        in_specs=[
            pl.BlockSpec((R, HW), lambda g: (g, 0)),             # per-group activations
            pl.BlockSpec((R, R), lambda g: (0, 0)),              # folded weights, resident
            pl.BlockSpec((R, 1), lambda g: (0, 0)),              # folded bias, resident
        ],
        out_specs=pl.BlockSpec((R, HW), lambda g: (g, 0)),
        compiler_params=pltpu.CompilerParams(
            dimension_semantics=("parallel",),                   # batch groups are independent
        ),
    )(xf, at_big, b_big)

    return out.reshape(NP, C, H, W)[:N]


# ------------------------------ parameter init --------------------------------


def init_params(key, in_c, fc_dim=1000):
    ks = jax.random.split(key, 7)
    p = {}
    # nn.Linear(in_c, 1000): stored transposed as (in_c, 1000).
    p["wfc"] = 0.1 * jax.random.normal(ks[0], (in_c, fc_dim), dtype=jnp.float32)
    p["bfc"] = 0.1 * jax.random.normal(ks[1], (1, fc_dim), dtype=jnp.float32)
    # nn.Conv2d(1000, in_c, 1, bias=False): weight (in_c, 1000, 1, 1) -> (in_c, 1000).
    p["wc"] = 0.1 * jax.random.normal(ks[2], (in_c, fc_dim), dtype=jnp.float32)
    # BatchNorm2d(in_c): inference-mode running stats (synthetic).
    p["bn_g"] = 1.0 + 0.1 * jax.random.normal(ks[3], (in_c,), dtype=jnp.float32)
    p["bn_b"] = 0.1 * jax.random.normal(ks[4], (in_c,), dtype=jnp.float32)
    p["bn_m"] = 0.1 * jax.random.normal(ks[5], (in_c,), dtype=jnp.float32)
    p["bn_v"] = 0.5 + jax.random.uniform(ks[6], (in_c,), dtype=jnp.float32)
    return p


# ------------------------------ pure-JAX reference ----------------------------


def ref_attention(x, p, eps=1e-5):
    N, C, H, W = x.shape
    att = jnp.mean(x, axis=(2, 3))                       # AdaptiveAvgPool2d(1) -> (N, C)
    att = att @ p["wfc"] + p["bfc"][0]                   # Linear(C, 1000)      -> (N, F)
    att = att @ p["wc"].T                                # 1x1 conv, no bias    -> (N, C)
    s = p["bn_g"] / jnp.sqrt(p["bn_v"] + eps)
    t = p["bn_b"] - s * p["bn_m"]
    att = jnp.maximum(att * s + t, 0.0)                  # BN (inference) + ReLU
    return x * att[:, :, None, None]                     # x * att.expand_as(x)


# ----------------------------------- main --------------------------------------


if __name__ == "__main__":
    key = jax.random.PRNGKey(0)
    kx, kp = jax.random.split(key)

    N, C, H, W = 2, 4, 16, 16
    x = jax.random.normal(kx, (N, C, H, W), dtype=jnp.float32)
    params = init_params(kp, C)

    out = attention_forward(x, params)
    out = jax.block_until_ready(out)

    assert out.shape == (N, C, H, W), out.shape
    ref = ref_attention(x, params)
    err = float(jnp.max(jnp.abs(out - ref)))
    assert jnp.allclose(out, ref, rtol=1e-4, atol=1e-4), err

    print("KERNEL_OK")
</pallas_src>

<mosaic_0001>
module attributes {stable_mosaic.version = 11 : i64} {
  func.func @_attention_kernel(%arg0: i32, %arg1: memref<8x256xf32, #tpu.memory_space<vmem>>, %arg2: memref<8x8xf32, #tpu.memory_space<vmem>>, %arg3: memref<8x1xf32, #tpu.memory_space<vmem>>, %arg4: memref<8x256xf32, #tpu.memory_space<vmem>>) attributes {dimension_semantics = [#tpu.dimension_semantics<parallel>], iteration_bounds = array<i64: 1>, scalar_prefetch = 0 : i64, scratch_operands = 0 : i64, tpu.core_type = #tpu.core_type<tc>, window_params = [{transform_indices = @transform_0, window_bounds = array<i64: 8, 256>}, {pipeline_mode = #tpu.pipeline_mode<synchronous>, transform_indices = @transform_1, window_bounds = array<i64: 8, 8>}, {pipeline_mode = #tpu.pipeline_mode<synchronous>, transform_indices = @transform_2, window_bounds = array<i64: 8, 1>}, {transform_indices = @transform_3, window_bounds = array<i64: 8, 256>}]} {
    %c0 = arith.constant 0 : index
    %c0_0 = arith.constant 0 : index
    %0 = vector.load %arg1[%c0, %c0_0] : memref<8x256xf32, #tpu.memory_space<vmem>>, vector<8x256xf32>
    %cst = arith.constant dense<0.000000e+00> : vector<8xf32>
    %1 = vector.multi_reduction <add>, %0, %cst [1] : vector<8x256xf32> to vector<8xf32>
    %2 = vector.shape_cast %1 : vector<8xf32> to vector<8x1xf32>
    %c0_1 = arith.constant 0 : index
    %c0_2 = arith.constant 0 : index
    %3 = vector.load %arg2[%c0_1, %c0_2] : memref<8x8xf32, #tpu.memory_space<vmem>>, vector<8x8xf32>
    %c0_3 = arith.constant 0 : index
    %c0_4 = arith.constant 0 : index
    %4 = vector.load %arg3[%c0_3, %c0_4] : memref<8x1xf32, #tpu.memory_space<vmem>>, vector<8x1xf32>
    %5 = vector.extract_strided_slice %2 {offsets = [0, 0], sizes = [1, 1], strides = [1, 1]} : vector<8x1xf32> to vector<1x1xf32>
    %6 = vector.extract_strided_slice %3 {offsets = [0, 0], sizes = [8, 1], strides = [1, 1]} : vector<8x8xf32> to vector<8x1xf32>
    %7 = vector.broadcast %5 : vector<1x1xf32> to vector<8x1xf32>
    %8 = arith.mulf %7, %6 : vector<8x1xf32>
    %9 = arith.addf %4, %8 : vector<8x1xf32>
    %10 = vector.extract_strided_slice %2 {offsets = [1, 0], sizes = [1, 1], strides = [1, 1]} : vector<8x1xf32> to vector<1x1xf32>
    %11 = vector.extract_strided_slice %3 {offsets = [0, 1], sizes = [8, 1], strides = [1, 1]} : vector<8x8xf32> to vector<8x1xf32>
    %12 = vector.broadcast %10 : vector<1x1xf32> to vector<8x1xf32>
    %13 = arith.mulf %12, %11 : vector<8x1xf32>
    %14 = arith.addf %9, %13 : vector<8x1xf32>
    %15 = vector.extract_strided_slice %2 {offsets = [2, 0], sizes = [1, 1], strides = [1, 1]} : vector<8x1xf32> to vector<1x1xf32>
    %16 = vector.extract_strided_slice %3 {offsets = [0, 2], sizes = [8, 1], strides = [1, 1]} : vector<8x8xf32> to vector<8x1xf32>
    %17 = vector.broadcast %15 : vector<1x1xf32> to vector<8x1xf32>
    %18 = arith.mulf %17, %16 : vector<8x1xf32>
    %19 = arith.addf %14, %18 : vector<8x1xf32>
    %20 = vector.extract_strided_slice %2 {offsets = [3, 0], sizes = [1, 1], strides = [1, 1]} : vector<8x1xf32> to vector<1x1xf32>
    %21 = vector.extract_strided_slice %3 {offsets = [0, 3], sizes = [8, 1], strides = [1, 1]} : vector<8x8xf32> to vector<8x1xf32>
    %22 = vector.broadcast %20 : vector<1x1xf32> to vector<8x1xf32>
    %23 = arith.mulf %22, %21 : vector<8x1xf32>
    %24 = arith.addf %19, %23 : vector<8x1xf32>
    %25 = vector.extract_strided_slice %2 {offsets = [4, 0], sizes = [1, 1], strides = [1, 1]} : vector<8x1xf32> to vector<1x1xf32>
    %26 = vector.extract_strided_slice %3 {offsets = [0, 4], sizes = [8, 1], strides = [1, 1]} : vector<8x8xf32> to vector<8x1xf32>
    %27 = vector.broadcast %25 : vector<1x1xf32> to vector<8x1xf32>
    %28 = arith.mulf %27, %26 : vector<8x1xf32>
    %29 = arith.addf %24, %28 : vector<8x1xf32>
    %30 = vector.extract_strided_slice %2 {offsets = [5, 0], sizes = [1, 1], strides = [1, 1]} : vector<8x1xf32> to vector<1x1xf32>
    %31 = vector.extract_strided_slice %3 {offsets = [0, 5], sizes = [8, 1], strides = [1, 1]} : vector<8x8xf32> to vector<8x1xf32>
    %32 = vector.broadcast %30 : vector<1x1xf32> to vector<8x1xf32>
    %33 = arith.mulf %32, %31 : vector<8x1xf32>
    %34 = arith.addf %29, %33 : vector<8x1xf32>
    %35 = vector.extract_strided_slice %2 {offsets = [6, 0], sizes = [1, 1], strides = [1, 1]} : vector<8x1xf32> to vector<1x1xf32>
    %36 = vector.extract_strided_slice %3 {offsets = [0, 6], sizes = [8, 1], strides = [1, 1]} : vector<8x8xf32> to vector<8x1xf32>
    %37 = vector.broadcast %35 : vector<1x1xf32> to vector<8x1xf32>
    %38 = arith.mulf %37, %36 : vector<8x1xf32>
    %39 = arith.addf %34, %38 : vector<8x1xf32>
    %40 = vector.extract_strided_slice %2 {offsets = [7, 0], sizes = [1, 1], strides = [1, 1]} : vector<8x1xf32> to vector<1x1xf32>
    %41 = vector.extract_strided_slice %3 {offsets = [0, 7], sizes = [8, 1], strides = [1, 1]} : vector<8x8xf32> to vector<8x1xf32>
    %42 = vector.broadcast %40 : vector<1x1xf32> to vector<8x1xf32>
    %43 = arith.mulf %42, %41 : vector<8x1xf32>
    %44 = arith.addf %39, %43 : vector<8x1xf32>
    %cst_5 = arith.constant 0.000000e+00 : f32
    %45 = vector.broadcast %cst_5 : f32 to vector<8x1xf32>
    %46 = arith.maximumf %44, %45 : vector<8x1xf32>
    %47 = vector.broadcast %46 : vector<8x1xf32> to vector<8x256xf32>
    %48 = arith.mulf %0, %47 : vector<8x256xf32>
    %c0_6 = arith.constant 0 : index
    %c0_7 = arith.constant 0 : index
    %49 = vector.load %arg4[%c0_6, %c0_7] : memref<8x256xf32, #tpu.memory_space<vmem>>, vector<8x256xf32>
    tpu.vector_store %arg4[%c0_6, %c0_7], %48 {strides = array<i32>} : memref<8x256xf32, #tpu.memory_space<vmem>>, vector<8x256xf32>,
    return
  }
  func.func @transform_0(%arg0: i32) -> (i32, i32) {
    %c0_i32 = arith.constant 0 : i32
    %c0_i32_0 = arith.constant 0 : i32
    return %arg0, %c0_i32 : i32, i32
  }
  func.func @transform_1(%arg0: i32) -> (i32, i32) {
    %c0_i32 = arith.constant 0 : i32
    %c0_i32_0 = arith.constant 0 : i32
    %c0_i32_1 = arith.constant 0 : i32
    return %c0_i32, %c0_i32_0 : i32, i32
  }
  func.func @transform_2(%arg0: i32) -> (i32, i32) {
    %c0_i32 = arith.constant 0 : i32
    %c0_i32_0 = arith.constant 0 : i32
    %c0_i32_1 = arith.constant 0 : i32
    return %c0_i32, %c0_i32_0 : i32, i32
  }
  func.func @transform_3(%arg0: i32) -> (i32, i32) {
    %c0_i32 = arith.constant 0 : i32
    %c0_i32_0 = arith.constant 0 : i32
    return %arg0, %c0_i32 : i32, i32
  }
}

</mosaic_0001>

<bundles_post_ra>
// kernel: tpu_custom_call.1
= control target key start
LH: loop header
LB: loop body
LE: loop exit
PB: predicated region body
PF: predicated region fallthrough
CT: control target
= control target key end

     0   :  { %8 = vsyncpa [#allocation3], 0  ;;  %s221_s0 = inlined_call_operand.hbm [shape: f32[8,256], index: 0, kind: input, shape index: {}]   ;;  %s222_s1 = inlined_call_operand.vmem [shape: f32[8,8], index: 1, kind: input, shape index: {}]   ;;  %s223_s2 = inlined_call_operand.vmem [shape: f32[8,1], index: 2, kind: input, shape index: {}]   ;;  %s224_s3 = inlined_call_operand.hbm [shape: f32[8,256], index: 3, kind: output, shape index: {}]  }
   0x1   :  { %9 = vsyncpa [#allocation4], 0  ;;  %s15_s14 = sshll.u32 %s221_s0, 4  ;;  %s179_s15 = smov [#allocation2]   ;;  %s16_s14 = int_to_ptr.hbm [resolvable:$true] %s15_s14 }
   0x2   :  { %s17_s16 = sshll.u32 %s179_s15, 4  ;;  %s18_s16 = int_to_ptr.vmem [resolvable:$true] %s17_s16 }
   0x3   :  { %20 = dma.hbm_to_vmem [thread:$0]  %s16_s14, 256, %s18_s16, [#allocation3]  }
   0x4   :  { %175 = dma.done.wait [#allocation3], 256  }
   0x5   :  { %176 = vsyncadd [#allocation3], 4294967040  ;;  %v29_v0 = vld [vmem:[#allocation2] sm:$0xff]  ;;  %v30_v1 = vld [vmem:[#allocation2 + $0x8] sm:$0xff]  ;;  %s180_s0 = smov 124   ;;  %s181_s19 = smov 126  }
   0x6   :  { %v31_v2 = vadd.f32 %v30_v1, %v29_v0  ;;  %v34_v4 = vld [vmem:[%s222_s1] sm:$0xff]  ;;  %s182_s20 = smov 127   ;;  %s183_s21 = smov 123   ;;  %v187_v19 = vmov 0  }
   0x7   :  { %s184_s22 = smov 125   ;;  %s185_s1 = smov 121   ;;  %125 = vset.pattern.permute.xlu1 %v187_v19  ;;  %126 = vset.pattern.permute.xlu0 %v187_v19  ;;  %v35_v23 = vld [vmem:[%s223_s2] sm:$0xff] }
   0x8   :  { %32 = vadd.xlane.f32.xlu0 %v31_v2  ;;  %s186_s23 = smov 122   ;;  %s188_s26 = smov [#allocation5]  }
   0x9   :  { %s103_s27 = sshll.u32 %s188_s26, 4  ;;  %s105_s29 = sshll.u32 %s224_s3, 4  ;;  %s104_s27 = int_to_ptr.vmem [resolvable:$true] %s103_s27  ;;  %s106_s29 = int_to_ptr.hbm [resolvable:$true] %s105_s29 }
  0x7b   :  { %v33_v3 = vpop.xlane.xlu0 %32 }
  0x7c   :  { %v60_v5 = vperm.slane %v33_v3, 4  ;;  %v46_v6 = vperm.slane %v33_v3, 2  ;;  %v39_v7 = vperm.slane %v33_v3, 1  ;;  %v67_v11 = vperm.slane %v33_v3, 5 }
  0x7d   :  { %v53_v12 = vperm.slane %v33_v3, 3  ;;  %v81_v15 = vperm.slane %v33_v3, 7  ;;  %v74_v16 = vperm.slane %v33_v3, 6  ;;  %v36_v20 = vperm.slane %v33_v3, 0 }
  0x7e   :  { %v61_v8 = vmul.f32 %v60_v5, %v34_v4  ;;  %v47_v9 = vmul.f32 %v46_v6, %v34_v4  ;;  %v40_v10 = vmul.f32 %v39_v7, %v34_v4  ;;  %v68_v13 = vmul.f32 %v67_v11, %v34_v4 }
  0x7f   :  { %v54_v14 = vmul.f32 %v53_v12, %v34_v4  ;;  %v82_v17 = vmul.f32 %v81_v15, %v34_v4  ;;  %v75_v18 = vmul.f32 %v74_v16, %v34_v4  ;;  %v37_v21 = vmul.f32 %v36_v20, %v34_v4 }
  0x80   :  { %63 = vrot.lane.b32.xlu2 %v61_v8, %s180_s0  ;;  %49 = vrot.lane.b32.xlu1 %v47_v9, %s181_s19 }
  0x81   :  { %42 = vrot.lane.b32.xlu0 %v40_v10, %s182_s20  ;;  %v38_v26 = vadd.f32 %v37_v21, %v35_v23 }
  0x88   :  { %70 = vrot.lane.b32.xlu2 %v68_v13, %s183_s21  ;;  %56 = vrot.lane.b32.xlu1 %v54_v14, %s184_s22 }
  0x90   :  { %84 = vrot.lane.b32.xlu2 %v82_v17, %s185_s1  ;;  %77 = vrot.lane.b32.xlu1 %v75_v18, %s186_s23 }
  0xda   :  { %v64_v22 = vpop.permute.xlu2 %63 }
  0xe2   :  { %v71_v29 = vpop.permute.xlu2 %70 }
  0xea   :  { %v85_v36 = vpop.permute.xlu2 %84 }
  0xf2   :  { %v50_v24 = vpop.permute.xlu1 %49 }
  0xf3   :  { %v43_v25 = vpop.permute.xlu0 %42 }
  0xf4   :  { %v45_v27 = vadd.f32 %v43_v25, %v38_v26 }
  0xf6   :  { %v52_v28 = vadd.f32 %v50_v24, %v45_v27 }
  0xfa   :  { %v57_v30 = vpop.permute.xlu1 %56 }
  0xfb   :  { %v59_v31 = vadd.f32 %v57_v30, %v52_v28 }
  0xfd   :  { %v66_v32 = vadd.f32 %v64_v22, %v59_v31 }
  0xff   :  { %v73_v33 = vadd.f32 %v71_v29, %v66_v32 }
 0x102   :  { %v78_v34 = vpop.permute.xlu1 %77 }
 0x103   :  { %v80_v35 = vadd.f32 %v78_v34, %v73_v33 }
 0x105   :  { %v87_v37 = vadd.f32 %v85_v36, %v80_v35 }
 0x107   :  { %v88_v38 = vmax.f32 %v87_v37, 0.0 }
 0x109   :  { %91 = vperm.xlu1 %125, %v88_v38  }
 0x17b   :  { %v92_v39 = vpop.permute.xlu1 %91 }
 0x17c   :  { %v94_v40 = vmul.f32 %v92_v39, %v29_v0  ;;  %v95_v41 = vmul.f32 %v92_v39, %v30_v1 }
 0x17e   :  { %96 = vst [vmem:[#allocation5] sm:$0xff] %v94_v40 }
 0x17f   :  { %97 = vst [vmem:[#allocation5 + $0x8] sm:$0xff] %v95_v41 }
 0x180   :  { %108 = dma.vmem_to_hbm [thread:$0]  %s104_s27, 256, %s106_s29, [#allocation4]  }
 0x181   :  { %177 = dma.done.wait [#allocation4], 256  }
 0x182   :  { %178 = vsyncadd [#allocation4], 4294967040 }
 0x183   :  { %113 = vsyncpa [#allocation3], 1 }
 0x184   :  { %114 = vsyncpa [#allocation4], 1 }

</bundles_post_ra>
